<compile_context>
chip_gen: v7x
topology: tpu7x:2x2x1
jax: 0.10.0
libtpu: 0.0.40
codegen_flags: <defaults>
</compile_context>

<pallas_src>
import functools

import jax
import jax.numpy as jnp
from jax.experimental import pallas as pl
from jax.experimental.pallas import tpu as pltpu


def _round_up(n, m):
    return ((n + m - 1) // m) * m


def _critic_kernel(x_ref, w1_ref, b1_ref, w2_ref, b2_ref, w3_ref, b3_ref, o_ref):
    # Feature-major, lane-dense layout: activations are (features, batch_tile).
    x = x_ref[...]                                                        # (S, TB)

    # fc1 + relu
    h1 = jnp.dot(w1_ref[...], x, preferred_element_type=jnp.float32) + b1_ref[...]
    h1 = jnp.maximum(h1, 0.0)                                             # (16, TB)

    # fc2 + relu
    h2 = jnp.dot(w2_ref[...], h1, preferred_element_type=jnp.float32) + b2_ref[...]
    h2 = jnp.maximum(h2, 0.0)                                             # (16, TB)

    # fc3 (no activation)
    v = jnp.dot(w3_ref[...], h2, preferred_element_type=jnp.float32) + b3_ref[...]

    o_ref[...] = v.astype(o_ref.dtype)                                    # (1, TB) lane-dense store


def _choose_tile(batch, tile_b):
    """Lane-align the requested tile and guarantee >= 2 grid steps when possible."""
    tile_b = max(128, (min(int(tile_b), 65536) // 128) * 128)   # multiple of 128
    b128 = _round_up(batch, 128)
    if b128 >= 2 * 128:
        # Cap so the 1-D grid has at least 2 steps -> both v7x TensorCores get work.
        half = _round_up(-(-b128 // 2), 128)
        tile_b = min(tile_b, half)
    else:
        tile_b = b128                                            # single 128-lane tile
    return tile_b


def _critic_pallas_fm(x_fm, params, *, tile_b=16384):
    """Feature-major Pallas path: x_fm is (state_dim, B) f32 -> (1, B) f32.

    Preferred entry point when the producer already holds feature-major
    activations: no wrapper transpose pass at all."""
    S, B = x_fm.shape
    tb = _choose_tile(B, tile_b)
    B_pad = _round_up(B, tb)
    if B_pad != B:
        x_fm = jnp.pad(x_fm, ((0, 0), (0, B_pad - B)))          # zero-pad batch tail

    grid = (B_pad // tb,)
    const = lambda i: (0, 0)   # weights/biases: same block every step -> VMEM-resident

    # Explicit scoped-VMEM budget (v5e default is only 16 MiB); sized from the tile.
    x_bytes = 2 * _round_up(S, 8) * tb * 4        # double-buffered x tile
    o_bytes = 2 * 8 * tb * 4                      # double-buffered (1, tb) out tile (sublane-padded)
    w_bytes = 2 * 6 * 16 * 128 * 4                # six tiny weight/bias blocks (generous)
    vmem_limit = int(min(x_bytes + o_bytes + w_bytes + (4 << 20), 64 << 20))

    out_fm = pl.pallas_call(
        _critic_kernel,
        out_shape=jax.ShapeDtypeStruct((1, B_pad), jnp.float32),
        grid=grid,
        in_specs=[
            pl.BlockSpec((S, tb), lambda i: (0, i)),             # x tile (pipelined)
            pl.BlockSpec(params["w1"].shape, const),             # (16, S)
            pl.BlockSpec(params["b1"].shape, const),             # (16, 1)
            pl.BlockSpec(params["w2"].shape, const),             # (16, 16)
            pl.BlockSpec(params["b2"].shape, const),             # (16, 1)
            pl.BlockSpec(params["w3"].shape, const),             # (1, 16)
            pl.BlockSpec(params["b3"].shape, const),             # (1, 1)
        ],
        out_specs=pl.BlockSpec((1, tb), lambda i: (0, i)),
        compiler_params=pltpu.CompilerParams(
            dimension_semantics=("parallel",),                   # 2 TCs on v7x; no-op on v5e/v6e
            vmem_limit_bytes=vmem_limit,
        ),
    )(
        x_fm,
        params["w1"], params["b1"],
        params["w2"], params["b2"],
        params["w3"], params["b3"],
    )
    return out_fm[:, :B]


def _critic_pallas(x, params, *, tile_b=16384):
    """Batch-major Pallas path: x is (B, state_dim) f32 -> (B, 1) f32.

    The transpose to feature-major plus the batch zero-pad are adjacent ops and
    fuse into a single XLA copy under jit; use _critic_pallas_fm to skip it."""
    out_fm = _critic_pallas_fm(x.T, params, tile_b=tile_b)
    return out_fm.T                                              # back to (B, 1)


def critic_reference(x, params):
    """Pure-JAX reference (also the fused-XLA fallback for small batches)."""
    h1 = jnp.maximum(x @ params["w1"].T + params["b1"].T, 0.0)
    h2 = jnp.maximum(h1 @ params["w2"].T + params["b2"].T, 0.0)
    return h2 @ params["w3"].T + params["b3"].T


def critic_forward(x, params, *, tile_b=16384, min_pallas_batch=4096):
    """Dispatch: below `min_pallas_batch` rows the launch + layout-plumbing
    overhead dominates, so let XLA fuse the tiny MLP instead.  Crossover is a
    per-chip tuning knob; 4096 keeps the Pallas path to >= 2 decent tiles."""
    if x.shape[0] < min_pallas_batch:
        return critic_reference(x, params)
    return _critic_pallas(x, params, tile_b=tile_b)


def critic_forward_feature_major(x_fm, params, *, tile_b=16384, min_pallas_batch=4096):
    """Same as critic_forward but for producers emitting (state_dim, B) activations."""
    if x_fm.shape[1] < min_pallas_batch:
        return critic_reference(x_fm.T, params).T
    return _critic_pallas_fm(x_fm, params, tile_b=tile_b)


def init_params(key, state_dim):
    """PyTorch nn.Linear-style init: U[-1/sqrt(fan_in), +1/sqrt(fan_in)].
    Weights stored as (out_features, in_features), biases as (out_features, 1)."""
    dims = [(state_dim, 16), (16, 16), (16, 1)]
    params = {}
    for i, (fan_in, fan_out) in enumerate(dims, start=1):
        key, kw, kb = jax.random.split(key, 3)
        bound = 1.0 / (fan_in ** 0.5)
        params[f"w{i}"] = jax.random.uniform(
            kw, (fan_out, fan_in), jnp.float32, -bound, bound)
        params[f"b{i}"] = jax.random.uniform(
            kb, (fan_out, 1), jnp.float32, -bound, bound)
    return params


if __name__ == "__main__":
    key = jax.random.PRNGKey(0)
    state_dim = 8

    key, kp = jax.random.split(key)
    params = init_params(kp, state_dim)

    # Exercise the Pallas path directly at small shapes:
    #   B=4   -> single 128-lane tile (padded tail)
    #   B=300 -> auto tile picks 256 lanes -> 2-step grid (megacore split) + ragged tail
    for batch, tile_b in [(4, 128), (300, 16384)]:
        key, kx = jax.random.split(key)
        x = jax.random.normal(kx, (batch, state_dim), jnp.float32)

        run = jax.jit(functools.partial(_critic_pallas, tile_b=tile_b))
        out = jax.block_until_ready(run(x, params))
        ref = critic_reference(x, params)

        assert out.shape == (batch, 1), out.shape
        assert jnp.allclose(out, ref, atol=1e-5, rtol=1e-5)

    # Feature-major entry point (producer already holds (S, B) activations; no
    # wrapper transpose pass).  B=260 -> 256-lane tile, 2-step grid, ragged tail.
    key, kx = jax.random.split(key)
    x_fm = jax.random.normal(kx, (state_dim, 260), jnp.float32)
    out_fm = jax.block_until_ready(jax.jit(_critic_pallas_fm)(x_fm, params))
    ref_fm = critic_reference(x_fm.T, params).T
    assert out_fm.shape == (1, 260), out_fm.shape
    assert jnp.allclose(out_fm, ref_fm, atol=1e-5, rtol=1e-5)

    # Dispatch wrapper: tiny batch routes to the fused-XLA fallback.
    key, kx = jax.random.split(key)
    x_tiny = jax.random.normal(kx, (8, state_dim), jnp.float32)
    out_tiny = jax.block_until_ready(critic_forward(x_tiny, params))
    assert jnp.allclose(out_tiny, critic_reference(x_tiny, params), atol=1e-5, rtol=1e-5)

    print("KERNEL_OK")
</pallas_src>

<mosaic_0001>
module attributes {stable_mosaic.version = 11 : i64} {
  func.func @_critic_kernel(%arg0: i32, %arg1: memref<8x128xf32, #tpu.memory_space<vmem>>, %arg2: memref<16x8xf32, #tpu.memory_space<vmem>>, %arg3: memref<16x1xf32, #tpu.memory_space<vmem>>, %arg4: memref<16x16xf32, #tpu.memory_space<vmem>>, %arg5: memref<16x1xf32, #tpu.memory_space<vmem>>, %arg6: memref<1x16xf32, #tpu.memory_space<vmem>>, %arg7: memref<1x1xf32, #tpu.memory_space<vmem>>, %arg8: memref<1x128xf32, #tpu.memory_space<vmem>>) attributes {dimension_semantics = [#tpu.dimension_semantics<parallel>], iteration_bounds = array<i64: 1>, scalar_prefetch = 0 : i64, scratch_operands = 0 : i64, tpu.core_type = #tpu.core_type<tc>, window_params = [{transform_indices = @transform_0, window_bounds = array<i64: 8, 128>}, {pipeline_mode = #tpu.pipeline_mode<synchronous>, transform_indices = @transform_1, window_bounds = array<i64: 16, 8>}, {pipeline_mode = #tpu.pipeline_mode<synchronous>, transform_indices = @transform_2, window_bounds = array<i64: 16, 1>}, {pipeline_mode = #tpu.pipeline_mode<synchronous>, transform_indices = @transform_3, window_bounds = array<i64: 16, 16>}, {pipeline_mode = #tpu.pipeline_mode<synchronous>, transform_indices = @transform_4, window_bounds = array<i64: 16, 1>}, {pipeline_mode = #tpu.pipeline_mode<synchronous>, transform_indices = @transform_5, window_bounds = array<i64: 1, 16>}, {pipeline_mode = #tpu.pipeline_mode<synchronous>, transform_indices = @transform_6, window_bounds = array<i64: 1, 1>}, {transform_indices = @transform_7, window_bounds = array<i64: 1, 128>}]} {
    %c0 = arith.constant 0 : index
    %c0_0 = arith.constant 0 : index
    %0 = vector.load %arg1[%c0, %c0_0] : memref<8x128xf32, #tpu.memory_space<vmem>>, vector<8x128xf32>
    %c0_1 = arith.constant 0 : index
    %c0_2 = arith.constant 0 : index
    %1 = vector.load %arg2[%c0_1, %c0_2] : memref<16x8xf32, #tpu.memory_space<vmem>>, vector<16x8xf32>
    %cst = arith.constant dense<0.000000e+00> : vector<16x128xf32>
    %2 = tpu.matmul %1, %0, %cst {dimension_numbers = #tpu.dot_dimension_numbers<[1], [0], [0], [1], [0, 0, 1, 1], [], []>} : vector<16x8xf32>, vector<8x128xf32>, vector<16x128xf32> -> vector<16x128xf32>
    %c0_3 = arith.constant 0 : index
    %c0_4 = arith.constant 0 : index
    %3 = vector.load %arg3[%c0_3, %c0_4] : memref<16x1xf32, #tpu.memory_space<vmem>>, vector<16x1xf32>
    %4 = vector.broadcast %3 : vector<16x1xf32> to vector<16x128xf32>
    %5 = arith.addf %2, %4 : vector<16x128xf32>
    %cst_5 = arith.constant 0.000000e+00 : f32
    %6 = vector.broadcast %cst_5 : f32 to vector<16x128xf32>
    %7 = arith.maximumf %5, %6 : vector<16x128xf32>
    %c0_6 = arith.constant 0 : index
    %c0_7 = arith.constant 0 : index
    %8 = vector.load %arg4[%c0_6, %c0_7] : memref<16x16xf32, #tpu.memory_space<vmem>>, vector<16x16xf32>
    %cst_8 = arith.constant dense<0.000000e+00> : vector<16x128xf32>
    %9 = tpu.matmul %8, %7, %cst_8 {dimension_numbers = #tpu.dot_dimension_numbers<[1], [0], [0], [1], [0, 0, 1, 1], [], []>} : vector<16x16xf32>, vector<16x128xf32>, vector<16x128xf32> -> vector<16x128xf32>
    %c0_9 = arith.constant 0 : index
    %c0_10 = arith.constant 0 : index
    %10 = vector.load %arg5[%c0_9, %c0_10] : memref<16x1xf32, #tpu.memory_space<vmem>>, vector<16x1xf32>
    %11 = vector.broadcast %10 : vector<16x1xf32> to vector<16x128xf32>
    %12 = arith.addf %9, %11 : vector<16x128xf32>
    %cst_11 = arith.constant 0.000000e+00 : f32
    %13 = vector.broadcast %cst_11 : f32 to vector<16x128xf32>
    %14 = arith.maximumf %12, %13 : vector<16x128xf32>
    %c0_12 = arith.constant 0 : index
    %c0_13 = arith.constant 0 : index
    %15 = vector.load %arg6[%c0_12, %c0_13] : memref<1x16xf32, #tpu.memory_space<vmem>>, vector<1x16xf32>
    %cst_14 = arith.constant dense<0.000000e+00> : vector<1x128xf32>
    %16 = tpu.matmul %15, %14, %cst_14 {dimension_numbers = #tpu.dot_dimension_numbers<[1], [0], [0], [1], [0, 0, 1, 1], [], []>} : vector<1x16xf32>, vector<16x128xf32>, vector<1x128xf32> -> vector<1x128xf32>
    %c0_15 = arith.constant 0 : index
    %c0_16 = arith.constant 0 : index
    %17 = vector.load %arg7[%c0_15, %c0_16] : memref<1x1xf32, #tpu.memory_space<vmem>>, vector<1x1xf32>
    %18 = vector.broadcast %17 : vector<1x1xf32> to vector<1x128xf32>
    %19 = arith.addf %16, %18 : vector<1x128xf32>
    %c0_17 = arith.constant 0 : index
    %c0_18 = arith.constant 0 : index
    %20 = vector.load %arg8[%c0_17, %c0_18] : memref<1x128xf32, #tpu.memory_space<vmem>>, vector<1x128xf32>
    tpu.vector_store %arg8[%c0_17, %c0_18], %19 {strides = array<i32>} : memref<1x128xf32, #tpu.memory_space<vmem>>, vector<1x128xf32>,
    return
  }
  func.func @transform_0(%arg0: i32) -> (i32, i32) {
    %c0_i32 = arith.constant 0 : i32
    %c0_i32_0 = arith.constant 0 : i32
    return %c0_i32, %arg0 : i32, i32
  }
  func.func @transform_1(%arg0: i32) -> (i32, i32) {
    %c0_i32 = arith.constant 0 : i32
    %c0_i32_0 = arith.constant 0 : i32
    %c0_i32_1 = arith.constant 0 : i32
    return %c0_i32, %c0_i32_0 : i32, i32
  }
  func.func @transform_2(%arg0: i32) -> (i32, i32) {
    %c0_i32 = arith.constant 0 : i32
    %c0_i32_0 = arith.constant 0 : i32
    %c0_i32_1 = arith.constant 0 : i32
    return %c0_i32, %c0_i32_0 : i32, i32
  }
  func.func @transform_3(%arg0: i32) -> (i32, i32) {
    %c0_i32 = arith.constant 0 : i32
    %c0_i32_0 = arith.constant 0 : i32
    %c0_i32_1 = arith.constant 0 : i32
    return %c0_i32, %c0_i32_0 : i32, i32
  }
  func.func @transform_4(%arg0: i32) -> (i32, i32) {
    %c0_i32 = arith.constant 0 : i32
    %c0_i32_0 = arith.constant 0 : i32
    %c0_i32_1 = arith.constant 0 : i32
    return %c0_i32, %c0_i32_0 : i32, i32
  }
  func.func @transform_5(%arg0: i32) -> (i32, i32) {
    %c0_i32 = arith.constant 0 : i32
    %c0_i32_0 = arith.constant 0 : i32
    %c0_i32_1 = arith.constant 0 : i32
    return %c0_i32, %c0_i32_0 : i32, i32
  }
  func.func @transform_6(%arg0: i32) -> (i32, i32) {
    %c0_i32 = arith.constant 0 : i32
    %c0_i32_0 = arith.constant 0 : i32
    %c0_i32_1 = arith.constant 0 : i32
    return %c0_i32, %c0_i32_0 : i32, i32
  }
  func.func @transform_7(%arg0: i32) -> (i32, i32) {
    %c0_i32 = arith.constant 0 : i32
    %c0_i32_0 = arith.constant 0 : i32
    return %c0_i32, %arg0 : i32, i32
  }
}

</mosaic_0001>

<bundles_post_ra>
// kernel: _critic_pallas.1
= control target key start
LH: loop header
LB: loop body
LE: loop exit
PB: predicated region body
PF: predicated region fallthrough
CT: control target
= control target key end

     0   :  { %vm43_vm0 = vcmask 64512   ;;  %v361_v3 = vmov 0   ;;  %vm141_vm1 = vcmask 130048   ;;  %v362_v21 = vmov 0.0|0.0   ;;  %s446_s0 = inlined_call_operand.vmem [shape: f32[8,128], index: 0, kind: input, shape index: {}]   ;;  %s447_s1 = inlined_call_operand.vmem [shape: f32[16,8], index: 1, kind: input, shape index: {}]   ;;  %s448_s2 = inlined_call_operand.vmem [shape: f32[16,1], index: 2, kind: input, shape index: {}]   ;;  %s449_s6 = inlined_call_operand.<no memory space> [shape: f32[1,1], index: 6, kind: input, shape index: {}]   ;;  %s450_s3 = inlined_call_operand.vmem [shape: f32[16,16], index: 3, kind: input, shape index: {}]   ;;  %s451_s4 = inlined_call_operand.vmem [shape: f32[16,1], index: 4, kind: input, shape index: {}]   ;;  %s452_s5 = inlined_call_operand.vmem [shape: f32[1,16], index: 5, kind: input, shape index: {}]   ;;  %s453_s7 = inlined_call_operand.vmem [shape: f32[1,128], index: 7, kind: output, shape index: {}]  }
   0x1   :  { %v28_v0 = vld [vmem:[%s446_s0] sm:$0xff]  ;;  %v30_v2 = vld [vmem:[%s447_s1 + $0x8] sm:$0xff]  ;;  %359 = vset.pattern.permute.xlu0 %v361_v3  ;;  %v12_v4 = vstv %s449_s6  ;;  %360 = vset.pattern.permute.xlu1 %v361_v3  ;;  %vm363_vm2 = vmmov 0   ;;  %v364_v22 = vmov 0.0   ;;  %v232_v33 = vlaneseq }
   0x2   :  { %v29_v1 = vld [vmem:[%s447_s1] sm:$0xff]  ;;  %329 = vmatprep.subr.mxu0 %v28_v0  ;;  %13 = vst [vmem:[#allocation2] sm:$0x1] %v12_v4  ;;  %v32_v6 = vld [vmem:[%s448_s2 + $0x8] sm:$0xff] }
   0x3   :  { %331 = vmatprep.mubr.msk.f32.mxu0 %vm43_vm0, %v29_v1  ;;  %v31_v5 = vld [vmem:[%s448_s2] sm:$0xff]  ;;  %330 = vmatpush3.msra.mxu0 %v28_v0  ;;  %v130_v10 = vld [vmem:[%s451_s4 + $0x8] sm:$0xff]  ;;  %v233_v34 = vshrl.u32 %v232_v33, 7 }
   0x4   :  { %35 = vperm.xlu0 %359, %v31_v5   ;;  %332 = vmatmul.mubr.msk.f32.vlgmr.msra.gmra.mrb[0].mxu0 %vm43_vm0, %v30_v2  ;;  %v127_v8 = vld [vmem:[%s450_s3] sm:$0xff]  ;;  %v128_v20 = vld [vmem:[%s450_s3 + $0x8] sm:$0xff] }
   0x5   :  { %338 = vmatprep.mubr.msk.f32.mxu1 %vm141_vm1, %v127_v8  ;;  %v129_v9 = vld [vmem:[%s451_s4] sm:$0xff]  ;;  %352 = vmatprep.subr.bf16.mxu0 %v362_v21  ;;  %v234_v35 = vsub.s32 0, %v233_v34 }
   0x6   :  { %133 = vperm.xlu1 %360, %v129_v9   ;;  %345 = vmatprep.mubr.msk.f32.mxu0 %vm363_vm2, %v364_v22  ;;  %v225_v32 = vld [vmem:[%s452_s5] sm:$0x1] }
   0x8   :  { %40 = vperm.xlu0 %359, %v32_v6  }
   0x9   :  { %v226_v7 = vld [vmem:[#allocation2] sm:$0x1] }
   0xa   :  { %138 = vperm.xlu1 %360, %v130_v10  }
   0xc   :  { %229 = vperm.xlu0 %359, %v226_v7  }
  0x83   :  { %v36_v11 = vpop.permute.xlu0 %35 }
  0x85   :  { %v134_v23 = vpop.permute.xlu1 %133 }
  0x87   :  { %v41_v12 = vpop.permute.xlu0 %40 }
  0x89   :  { %v139_v24 = vpop.permute.xlu1 %138 }
  0x8b   :  { %v230_v36 = vpop.permute.xlu0 %229 }
  0x8c   :  { %v235_v37 = vrot.slane %v230_v36, %v234_v35 }
  0xd7   :  { %v333_v13 = vpop.f32.mrb[0].mxu0 }
  0xd8   :  { %v122_v14 = vadd.f32 %v333_v13, %v41_v12  ;;  %v116_v15 = vpop.f32.mrb[1].mxu0 }
  0xd9   :  { %v117_v16 = vadd.f32 %v116_v15, %v36_v11 }
  0xda   :  { %v126_v17 = vmax.f32 %v122_v14, 0.0 }
  0xdb   :  { %v125_v18 = vmax.f32 %v117_v16, 0.0 }
  0xdd   :  { %v348_v19 = vpack.c.bf16 %v126_v17, %v125_v18 }
  0xdf   :  { %349 = vmatprep.subr.bf16.mxu1 %v348_v19 }
  0xe0   :  { %351 = vmatpush3.bf16.msra.mxu1 %v348_v19 }
  0xe3   :  { %339 = vmatmul.mubr.msk.f32.vlgmr.msra.gmra.mrb[0].mxu1 %vm141_vm1, %v128_v20 }
 0x1b6   :  { %v340_v25 = vpop.f32.mrb[0].mxu1 }
 0x1b7   :  { %v220_v26 = vadd.f32 %v340_v25, %v139_v24  ;;  %v214_v27 = vpop.f32.mrb[1].mxu1 }
 0x1b8   :  { %v215_v28 = vadd.f32 %v214_v27, %v134_v23 }
 0x1b9   :  { %v224_v29 = vmax.f32 %v220_v26, 0.0 }
 0x1ba   :  { %v223_v30 = vmax.f32 %v215_v28, 0.0 }
 0x1bc   :  { %v353_v31 = vpack.c.bf16 %v224_v29, %v223_v30 }
 0x1be   :  { %354 = vmatpush3.bf16.msra.mxu0 %v353_v31 }
 0x1c1   :  { %346 = vmatmul.mubr.msk.f32.vlgmr.msra.gmra.mrb[2].mxu0 %vm141_vm1, %v225_v32 }
 0x294   :  { %v305_v38 = vpop.f32.mrb[2].mxu0 }
 0x295   :  { %v306_v39 = vadd.f32 %v305_v38, %v235_v37  ;;  %v347_v40 = vpop.f32.mrb[3].mxu0 }
 0x297   :  { %309 = vst [vmem:[%s453_s7] sm:$0x1] %v306_v39 }

</bundles_post_ra>
